<compile_context>
chip_gen: v6e
topology: v6e:2x2x1
jax: 0.10.0
libtpu: 0.0.40
codegen_flags: <defaults>
</compile_context>

<pallas_src>
import functools

import jax
import jax.numpy as jnp
from jax.experimental import pallas as pl
from jax.experimental.pallas import tpu as pltpu


# ----------------------------------------------------------------------------
# Tiling / VMEM budgeting
# ----------------------------------------------------------------------------
_VMEM_TILE_BUDGET = 40 << 20   # bytes of VMEM reserved for the pipelined tiles
_VMEM_LIMIT_BYTES = 48 << 20   # scoped limit for Mosaic; fits v7x 64 MiB/TC
_MAX_TILE_ROWS = 1024          # >=512 rows already ~85% of HBM roofline
_MIN_TILE_ROWS = 128           # keep the ~0.35us per-step overhead amortized
_MIN_GRID_STEPS = 4            # v7x: 2 TCs x >=2 pipelined steps each


def _lane_pad(n):
    return -(-n // 128) * 128


def _sublane_multiple(itemsize):
    # sub-32-bit dtypes pack along sublanes: f32 -> 8, bf16 -> 16, int8 -> 32
    return 8 * max(1, 4 // int(itemsize))


def _choose_seq_tile(S, B, D, itemsize, seq_tile):
    sub = _sublane_multiple(itemsize)
    x_row = _lane_pad(B * D) * itemsize          # one lane-padded row of x / out
    pe_row = _lane_pad(D) * itemsize             # one lane-padded row of pe
    # The pipeline double-buffers x-in, pe-in and out.
    per_row = 2 * (2 * x_row + pe_row)
    budget_rows = max(sub, _VMEM_TILE_BUDGET // per_row)

    if seq_tile is None:
        # Enough steps for megacore + pipelining, but never tiny tiles.
        steps_rows = max(_MIN_TILE_ROWS, -(-S // _MIN_GRID_STEPS))
        ts = min(budget_rows, _MAX_TILE_ROWS, steps_rows)
    else:
        ts = min(int(seq_tile), budget_rows)

    ts = max(sub, (ts // sub) * sub)             # multiple of the sublane pack
    if ts >= S:
        ts = S                                   # single full-extent tile (also S < 8)
    return ts


# ----------------------------------------------------------------------------
# Pallas kernel
# ----------------------------------------------------------------------------
def _pos_enc_kernel(x_ref, pe_ref, o_ref, *, batch):
    # x_ref : (ts, B*D)   activations, batch folded into the lane dim (lane-dense)
    # pe_ref: (ts, D)     positional-encoding rows, read ONCE per tile from HBM
    # o_ref : (ts, B*D)
    pe = pe_ref[...]
    if batch > 1:
        # Replicate pe over the batch along lanes on-chip (copy work is fully
        # hidden behind the HBM traffic of this mem-bound kernel).
        pe = jnp.tile(pe, (1, batch))
    o_ref[...] = x_ref[...] + pe


def positional_encoding_forward(x, pe, *, seq_tile=None):
    """x: (S, B, D); pe: (max_len, 1, D) with max_len >= S.  Returns x + pe[:S]."""
    S, B, D = x.shape
    assert pe.ndim == 3 and pe.shape[1] == 1 and pe.shape[2] == D
    assert pe.shape[0] >= S, "sequence longer than the PE table (max_len)"

    # Lane-dense layout: (S, B, D) -> (S, B*D) is a free row-major reshape.
    x2d = x.reshape(S, B * D)
    pe2d = pe[:S, 0, :].astype(x.dtype)          # (S, D), tiny vs x traffic

    ts = _choose_seq_tile(S, B, D, x.dtype.itemsize, seq_tile)
    grid = (pl.cdiv(S, ts),)

    out2d = pl.pallas_call(
        functools.partial(_pos_enc_kernel, batch=B),
        grid=grid,
        in_specs=[
            pl.BlockSpec((ts, B * D), lambda i: (i, 0)),   # x tile (lane-dense)
            pl.BlockSpec((ts, D), lambda i: (i, 0)),       # pe tile (same rows)
        ],
        out_specs=pl.BlockSpec((ts, B * D), lambda i: (i, 0)),
        out_shape=jax.ShapeDtypeStruct((S, B * D), x.dtype),
        compiler_params=pltpu.CompilerParams(
            dimension_semantics=("parallel",),
            vmem_limit_bytes=_VMEM_LIMIT_BYTES,
        ),
    )(x2d, pe2d)

    return out2d.reshape(S, B, D)


# ----------------------------------------------------------------------------
# PE table (precompute, identical formula to the reference nn.Module)
# ----------------------------------------------------------------------------
def positional_encoding_table(d_model, max_len=5000):
    # Reproduces the reference exactly: div_term = 10000 ** (+i / d_model).
    # (The reference module implicitly assumes even d_model; assert it.)
    assert d_model % 2 == 0, "PositionalEncoding requires an even d_model"
    dim_indices = jnp.arange(0, d_model, 2, dtype=jnp.float32)
    div_term = 10000.0 ** (dim_indices / d_model)
    position = jnp.arange(0, max_len, dtype=jnp.float32)[:, None]
    pe = jnp.zeros((max_len, d_model), jnp.float32)
    pe = pe.at[:, 0::2].set(jnp.sin(position * div_term))
    pe = pe.at[:, 1::2].set(jnp.cos(position * div_term))
    return pe[:, None, :]  # (max_len, 1, d_model)


@functools.partial(jax.jit, static_argnames=("seq_tile",))
def pos_enc_jit(x, pe, seq_tile=None):
    return positional_encoding_forward(x, pe, seq_tile=seq_tile)


# ----------------------------------------------------------------------------
# Main
# ----------------------------------------------------------------------------
if __name__ == "__main__":
    d_model, max_len = 32, 5000
    seq_len, batch = 8, 2

    key = jax.random.PRNGKey(0)
    pe = positional_encoding_table(d_model, max_len)

    # --- small-shape run (matches the module's toy usage; single tile) ------
    x = jax.random.normal(key, (seq_len, batch, d_model), jnp.float32)
    out = jax.block_until_ready(pos_enc_jit(x, pe))
    ref = x + pe[:seq_len, :]
    assert out.shape == (seq_len, batch, d_model)
    assert bool(jnp.all(jnp.isfinite(out)))
    assert bool(jnp.allclose(out, ref, rtol=1e-6, atol=1e-6))

    # --- larger run: auto tile picks ts=128 -> multi-step grid + partial tile
    S2, B2 = 300, 4
    x2 = jax.random.normal(jax.random.PRNGKey(0), (S2, B2, d_model), jnp.float32)
    out2 = jax.block_until_ready(pos_enc_jit(x2, pe))
    ref2 = x2 + pe[:S2, :]
    assert bool(jnp.allclose(out2, ref2, rtol=1e-6, atol=1e-6))

    print("KERNEL_OK")
</pallas_src>

<mosaic_0001>
module attributes {stable_mosaic.version = 11 : i64} {
  func.func @_pos_enc_kernel(%arg0: i32, %arg1: memref<8x64xf32, #tpu.memory_space<vmem>>, %arg2: memref<8x32xf32, #tpu.memory_space<vmem>>, %arg3: memref<8x64xf32, #tpu.memory_space<vmem>>) attributes {dimension_semantics = [#tpu.dimension_semantics<parallel>], iteration_bounds = array<i64: 1>, scalar_prefetch = 0 : i64, scratch_operands = 0 : i64, tpu.core_type = #tpu.core_type<tc>, window_params = [{transform_indices = @transform_0, window_bounds = array<i64: 8, 64>}, {transform_indices = @transform_1, window_bounds = array<i64: 8, 32>}, {transform_indices = @transform_2, window_bounds = array<i64: 8, 64>}]} {
    %c0 = arith.constant 0 : index
    %c0_0 = arith.constant 0 : index
    %0 = vector.load %arg2[%c0, %c0_0] : memref<8x32xf32, #tpu.memory_space<vmem>>, vector<8x32xf32>
    %1 = tpu.concatenate %0, %0 in 1 : vector<8x32xf32>, vector<8x32xf32> -> vector<8x64xf32>
    %c0_1 = arith.constant 0 : index
    %c0_2 = arith.constant 0 : index
    %2 = vector.load %arg1[%c0_1, %c0_2] : memref<8x64xf32, #tpu.memory_space<vmem>>, vector<8x64xf32>
    %3 = arith.addf %2, %1 : vector<8x64xf32>
    %c0_3 = arith.constant 0 : index
    %c0_4 = arith.constant 0 : index
    %4 = vector.load %arg3[%c0_3, %c0_4] : memref<8x64xf32, #tpu.memory_space<vmem>>, vector<8x64xf32>
    tpu.vector_store %arg3[%c0_3, %c0_4], %3 {strides = array<i32>} : memref<8x64xf32, #tpu.memory_space<vmem>>, vector<8x64xf32>,
    return
  }
  func.func @transform_0(%arg0: i32) -> (i32, i32) {
    %c0_i32 = arith.constant 0 : i32
    %c0_i32_0 = arith.constant 0 : i32
    return %arg0, %c0_i32 : i32, i32
  }
  func.func @transform_1(%arg0: i32) -> (i32, i32) {
    %c0_i32 = arith.constant 0 : i32
    %c0_i32_0 = arith.constant 0 : i32
    return %arg0, %c0_i32 : i32, i32
  }
  func.func @transform_2(%arg0: i32) -> (i32, i32) {
    %c0_i32 = arith.constant 0 : i32
    %c0_i32_0 = arith.constant 0 : i32
    return %arg0, %c0_i32 : i32, i32
  }
}

</mosaic_0001>

<bundles_post_ra>
// kernel: pos_enc_jit.1
= control target key start
LH: loop header
LB: loop body
LE: loop exit
PB: predicated region body
PF: predicated region fallthrough
CT: control target
= control target key end

     0   :  { %s27_s11 = smov 32   ;;  %vm16_vm0 = vcmask 261120   ;;  %vm20_vm1 = vcmask 523264   ;;  %s52_s1 = inlined_call_operand.vmem [shape: f32[8,32], index: 1, kind: input, shape index: {}]   ;;  %s53_s0 = inlined_call_operand.vmem [shape: f32[8,64], index: 0, kind: input, shape index: {}]   ;;  %s54_s2 = inlined_call_operand.vmem [shape: f32[8,64], index: 2, kind: output, shape index: {}]  }
   0x1   :  { %v11_v0 = vld [vmem:[%s52_s1] sm:$0xff] }
   0x2   :  { %13 = vrot.lane.b32.xlu0 %v11_v0, %s27_s11  ;;  %v18_v1 = vld [vmem:[%s53_s0] sm:$0xff] }
  0x74   :  { %v14_v2 = vpop.permute.xlu0 %13 }
  0x75   :  { %v17_v3 = vsel %vm16_vm0, %v11_v0, %v14_v2 }
  0x76   :  { %v19_v4 = vadd.f32 %v18_v1, %v17_v3 }
  0x78   :  { %21 = vst.msk [vmem:[%s54_s2] sm:$0xff] %vm20_vm1, %v19_v4 }

</bundles_post_ra>
